<compile_context>
chip_gen: v6e
topology: v6e:2x2x1
jax: 0.10.0
libtpu: 0.0.40
codegen_flags: <defaults>
</compile_context>

<pallas_src>
import functools

import jax
import jax.numpy as jnp
from jax.experimental import pallas as pl
from jax.experimental.pallas import tpu as pltpu


def _round_up(x, m):
    return ((x + m - 1) // m) * m


def linear_block_kernel(x_ref, w_ref, b_ref, o_ref, acc_ref, *, activation):
    """One (i, j, k) grid step of activation(x @ W + b), W already (K, N).

    x_ref:   (tm, tk)  input tile   (compute dtype, e.g. bf16)
    w_ref:   (tk, tn)  weight tile  (compute dtype, (in, out) layout -> NN matmul)
    b_ref:   (1,  tn)  bias tile    (f32)
    o_ref:   (tm, tn)  output tile  (resident across the K axis)
    acc_ref: (tm, tn)  f32 accumulator scratch in VMEM
    """
    k = pl.program_id(2)

    # MXU matmul with f32 accumulation (bf16 inputs -> full-rate MXU).
    partial_acc = jnp.dot(x_ref[...], w_ref[...],
                          preferred_element_type=jnp.float32)

    # First K step writes the accumulator directly: saves one zero-init store
    # + read per output tile (relieves the single vector-store slot on v5e).
    @pl.when(k == 0)
    def _():
        acc_ref[...] = partial_acc

    @pl.when(k > 0)
    def _():
        acc_ref[...] += partial_acc

    # Fused bias + activation epilogue on the final K step (f32 on the VPU,
    # single cast on store — also the right shape for v5e's non-bf16 VPU).
    @pl.when(k == pl.num_programs(2) - 1)
    def _():
        out = acc_ref[...] + b_ref[...].astype(jnp.float32)
        o_ref[...] = activation(out).astype(o_ref.dtype)


def linear_block(x, weight, bias, activation=jax.nn.relu,
                 tm=512, tn=512, tk=1024, compute_dtype=jnp.bfloat16):
    """activation(x @ weight.T + bias) — fused tiled Pallas TPU kernel.

    x:      (B, in_nums)
    weight: (out_nums, in_nums)   -- native PyTorch nn.Linear layout
    bias:   (out_nums,)

    `activation` must be elementwise (it is applied per output tile).
    x and weight are cast to `compute_dtype` (bf16 by default); accumulation,
    bias add and activation stay in f32; output dtype is x.dtype.
    """
    B, in_nums = x.shape
    out_nums, in_w = weight.shape
    assert in_w == in_nums, "weight must be (out_nums, in_nums)"
    assert bias.shape == (out_nums,)

    out_dtype = x.dtype

    # ---- tile sizing (lane dims multiples of 128, sublane dims of 8) -------
    tm = min(tm, _round_up(B, 8))
    n_aligned = _round_up(out_nums, 128)
    k_aligned = _round_up(in_nums, 128)
    tn = min(tn, n_aligned)
    tk = min(tk, k_aligned)

    # v7x has 2 TensorCores: if the batch only yields a single M tile, split N
    # into >=2 tiles (only when it adds no padding) so both cores get work via
    # the "parallel" semantics.  No-op on single-TC v5e/v6e.
    if _round_up(B, 8) <= tm and n_aligned >= 2 * 128:
        half = (n_aligned // 2) // 128 * 128
        if half >= 128 and n_aligned % half == 0:
            tn = min(tn, half)

    M = _round_up(B, tm)
    N = _round_up(out_nums, tn)
    K = _round_up(in_nums, tk)
    grid = (M // tm, N // tn, K // tk)

    # ---- operand prep: cast / transpose / pad all ride a single copy --------
    # Weight goes to (K, N) so the kernel does a plain NN contraction — no
    # chance of a per-grid-step XLU transpose; the transpose fuses into the
    # bf16-cast copy.  Padding is skipped when shapes are already aligned.
    x_c = x.astype(compute_dtype)
    if (M, K) != (B, in_nums):
        x_c = jnp.pad(x_c, ((0, M - B), (0, K - in_nums)))
    w_c = weight.T.astype(compute_dtype)
    if (K, N) != (in_nums, out_nums):
        w_c = jnp.pad(w_c, ((0, K - in_nums), (0, N - out_nums)))
    b_c = bias.astype(jnp.float32)
    if N != out_nums:
        b_c = jnp.pad(b_c, (0, N - out_nums))
    b_c = b_c.reshape(1, N)

    # ---- cost estimate: actual streamed bytes (x once per N tile, W once per
    # M tile), not one pass per operand. ------------------------------------
    in_bytes = jnp.dtype(compute_dtype).itemsize
    out_bytes = jnp.dtype(out_dtype).itemsize
    cost = pl.CostEstimate(
        flops=2 * M * N * K,
        transcendentals=0,
        bytes_accessed=(M * K * in_bytes) * grid[1]
                       + (K * N * in_bytes) * grid[0]
                       + (N * 4) * grid[0]
                       + M * N * out_bytes,
    )

    # ---- VMEM budget: raise the scoped limit only when needed (defaults are
    # 16 MiB on v5e / 32 MiB on v6e+); stay under v7x's 64 MiB physical. -----
    vmem_bytes = (2 * tm * tk * in_bytes      # x, double-buffered
                  + 2 * tk * tn * in_bytes    # W, double-buffered
                  + 2 * tn * 4                # bias, double-buffered
                  + 2 * tm * tn * out_bytes   # output, double-buffered
                  + tm * tn * 4)              # f32 accumulator scratch
    vmem_limit = None
    if vmem_bytes > 12 * 1024 * 1024:
        vmem_limit = min(2 * vmem_bytes, 56 * 1024 * 1024)

    out_padded = pl.pallas_call(
        functools.partial(linear_block_kernel, activation=activation),
        out_shape=jax.ShapeDtypeStruct((M, N), out_dtype),
        grid_spec=pltpu.PrefetchScalarGridSpec(
            num_scalar_prefetch=0,
            grid=grid,
            in_specs=[
                pl.BlockSpec((tm, tk), lambda i, j, k: (i, k)),   # x tile
                pl.BlockSpec((tk, tn), lambda i, j, k: (k, j)),   # W tile (K, N)
                pl.BlockSpec((1, tn), lambda i, j, k: (0, j)),    # bias tile
            ],
            out_specs=pl.BlockSpec((tm, tn), lambda i, j, k: (i, j)),
            scratch_shapes=[pltpu.VMEM((tm, tn), jnp.float32)],
        ),
        compiler_params=pltpu.CompilerParams(
            dimension_semantics=("parallel", "parallel", "arbitrary"),
            vmem_limit_bytes=vmem_limit,
        ),
        cost_estimate=cost,
    )(x_c, w_c, b_c)

    if (M, N) != (B, out_nums):
        return out_padded[:B, :out_nums]
    return out_padded


if __name__ == "__main__":
    key = jax.random.PRNGKey(0)

    def make_inputs(k, batch, in_nums, out_nums):
        kx, kw, kb = jax.random.split(k, 3)
        bound = 1.0 / (in_nums ** 0.5)
        x = jax.random.normal(kx, (batch, in_nums), dtype=jnp.float32)
        w = jax.random.uniform(kw, (out_nums, in_nums), jnp.float32, -bound, bound)
        b = jax.random.uniform(kb, (out_nums,), jnp.float32, -bound, bound)
        return x, w, b

    def f32_ref(x, w, b, act=jax.nn.relu):
        return act(x @ w.T + b)

    def bf16_ref(x, w, b, act=jax.nn.relu):
        y = jnp.dot(x.astype(jnp.bfloat16), w.T.astype(jnp.bfloat16),
                    preferred_element_type=jnp.float32)
        return act(y + b)

    k1, k2, k3 = jax.random.split(key, 3)

    # 1) Tiny shape consistent with nn.Linear(32, 64) on a batch of 8
    #    (exercises the padding path: in/out round up to 128 lanes).
    x, w, b = make_inputs(k1, batch=8, in_nums=32, out_nums=64)
    out = linear_block(x, w, b, activation=jax.nn.relu)
    jax.block_until_ready(out)
    assert out.shape == (8, 64) and out.dtype == x.dtype
    assert jnp.allclose(out, bf16_ref(x, w, b), atol=1e-3, rtol=1e-3)
    assert jnp.allclose(out, f32_ref(x, w, b), atol=2e-2, rtol=2e-2)

    # 2) Aligned shape exercising the full (M, N, K) grid + K-resident
    #    accumulator (no padding, no output slice).
    x2, w2, b2 = make_inputs(k2, batch=256, in_nums=512, out_nums=384)
    out2 = linear_block(x2, w2, b2, activation=jax.nn.relu,
                        tm=128, tn=128, tk=256)
    jax.block_until_ready(out2)
    assert out2.shape == (256, 384)
    assert jnp.allclose(out2, bf16_ref(x2, w2, b2), atol=1e-3, rtol=1e-3)
    assert jnp.allclose(out2, f32_ref(x2, w2, b2), atol=2e-2, rtol=2e-2)

    # 3) Exact-f32 compute path with a different elementwise activation.
    x3, w3, b3 = make_inputs(k3, batch=64, in_nums=256, out_nums=128)
    out3 = linear_block(x3, w3, b3, activation=jnp.tanh,
                        compute_dtype=jnp.float32)
    jax.block_until_ready(out3)
    assert out3.shape == (64, 128)
    assert jnp.allclose(out3, f32_ref(x3, w3, b3, jnp.tanh), atol=1e-4, rtol=1e-4)

    print("KERNEL_OK")
</pallas_src>

<mosaic_0001>
module attributes {stable_mosaic.version = 11 : i64} {
  func.func @linear_block_kernel(%arg0: i32, %arg1: i32, %arg2: i32, %arg3: memref<8x128xbf16, #tpu.memory_space<vmem>>, %arg4: memref<128x128xbf16, #tpu.memory_space<vmem>>, %arg5: memref<1x128xf32, #tpu.memory_space<vmem>>, %arg6: memref<8x128xf32, #tpu.memory_space<vmem>>, %arg7: memref<8x128xf32, #tpu.memory_space<vmem>>) attributes {dimension_semantics = [#tpu.dimension_semantics<parallel>, #tpu.dimension_semantics<parallel>, #tpu.dimension_semantics<arbitrary>], iteration_bounds = array<i64: 1, 1, 1>, scalar_prefetch = 0 : i64, scratch_operands = 1 : i64, tpu.core_type = #tpu.core_type<tc>, window_params = [{transform_indices = @transform_0, window_bounds = array<i64: 8, 128>}, {transform_indices = @transform_1, window_bounds = array<i64: 128, 128>}, {transform_indices = @transform_2, window_bounds = array<i64: 1, 128>}, {transform_indices = @transform_3, window_bounds = array<i64: 8, 128>}]} {
    %c0 = arith.constant 0 : index
    %c0_0 = arith.constant 0 : index
    %0 = vector.load %arg3[%c0, %c0_0] : memref<8x128xbf16, #tpu.memory_space<vmem>>, vector<8x128xbf16>
    %c0_1 = arith.constant 0 : index
    %c0_2 = arith.constant 0 : index
    %1 = vector.load %arg4[%c0_1, %c0_2] : memref<128x128xbf16, #tpu.memory_space<vmem>>, vector<128x128xbf16>
    %cst = arith.constant dense<0.000000e+00> : vector<8x128xf32>
    %2 = tpu.matmul %0, %1, %cst {dimension_numbers = #tpu.dot_dimension_numbers<[1], [0], [0], [1], [0, 0, 1, 1], [], []>} : vector<8x128xbf16>, vector<128x128xbf16>, vector<8x128xf32> -> vector<8x128xf32>
    %c0_i32 = arith.constant 0 : i32
    %3 = arith.cmpi eq, %arg2, %c0_i32 : i32
    %4 = arith.extui %3 : i1 to i32
    %c0_i32_3 = arith.constant 0 : i32
    %5 = arith.cmpi ne, %4, %c0_i32_3 : i32
    scf.if %5 {
      %c0_8 = arith.constant 0 : index
      %c0_9 = arith.constant 0 : index
      %12 = vector.load %arg7[%c0_8, %c0_9] : memref<8x128xf32, #tpu.memory_space<vmem>>, vector<8x128xf32>
      tpu.vector_store %arg7[%c0_8, %c0_9], %2 {strides = array<i32>} : memref<8x128xf32, #tpu.memory_space<vmem>>, vector<8x128xf32>,
    } else {
    }
    %c0_i32_4 = arith.constant 0 : i32
    %6 = arith.cmpi sgt, %arg2, %c0_i32_4 : i32
    %7 = arith.extui %6 : i1 to i32
    %c0_i32_5 = arith.constant 0 : i32
    %8 = arith.cmpi ne, %7, %c0_i32_5 : i32
    scf.if %8 {
      %c0_8 = arith.constant 0 : index
      %c0_9 = arith.constant 0 : index
      %12 = vector.load %arg7[%c0_8, %c0_9] : memref<8x128xf32, #tpu.memory_space<vmem>>, vector<8x128xf32>
      %13 = arith.addf %12, %2 : vector<8x128xf32>
      %c0_10 = arith.constant 0 : index
      %c0_11 = arith.constant 0 : index
      %14 = vector.load %arg7[%c0_10, %c0_11] : memref<8x128xf32, #tpu.memory_space<vmem>>, vector<8x128xf32>
      tpu.vector_store %arg7[%c0_10, %c0_11], %13 {strides = array<i32>} : memref<8x128xf32, #tpu.memory_space<vmem>>, vector<8x128xf32>,
    } else {
    }
    %c0_i32_6 = arith.constant 0 : i32
    %9 = arith.cmpi eq, %arg2, %c0_i32_6 : i32
    %10 = arith.extui %9 : i1 to i32
    %c0_i32_7 = arith.constant 0 : i32
    %11 = arith.cmpi ne, %10, %c0_i32_7 : i32
    scf.if %11 {
      %c0_8 = arith.constant 0 : index
      %c0_9 = arith.constant 0 : index
      %12 = vector.load %arg7[%c0_8, %c0_9] : memref<8x128xf32, #tpu.memory_space<vmem>>, vector<8x128xf32>
      %c0_10 = arith.constant 0 : index
      %c0_11 = arith.constant 0 : index
      %13 = vector.load %arg5[%c0_10, %c0_11] : memref<1x128xf32, #tpu.memory_space<vmem>>, vector<1x128xf32>
      %14 = vector.broadcast %13 : vector<1x128xf32> to vector<8x128xf32>
      %15 = arith.addf %12, %14 : vector<8x128xf32>
      %cst_12 = arith.constant 0.000000e+00 : f32
      %16 = vector.broadcast %cst_12 : f32 to vector<8x128xf32>
      %17 = arith.maximumf %15, %16 : vector<8x128xf32>
      %c0_13 = arith.constant 0 : index
      %c0_14 = arith.constant 0 : index
      %18 = vector.load %arg6[%c0_13, %c0_14] : memref<8x128xf32, #tpu.memory_space<vmem>>, vector<8x128xf32>
      tpu.vector_store %arg6[%c0_13, %c0_14], %17 {strides = array<i32>} : memref<8x128xf32, #tpu.memory_space<vmem>>, vector<8x128xf32>,
    } else {
    }
    return
  }
  func.func @transform_0(%arg0: i32, %arg1: i32, %arg2: i32) -> (i32, i32) {
    %c0_i32 = arith.constant 0 : i32
    return %arg0, %arg2 : i32, i32
  }
  func.func @transform_1(%arg0: i32, %arg1: i32, %arg2: i32) -> (i32, i32) {
    %c0_i32 = arith.constant 0 : i32
    return %arg2, %arg1 : i32, i32
  }
  func.func @transform_2(%arg0: i32, %arg1: i32, %arg2: i32) -> (i32, i32) {
    %c0_i32 = arith.constant 0 : i32
    %c0_i32_0 = arith.constant 0 : i32
    return %c0_i32, %arg1 : i32, i32
  }
  func.func @transform_3(%arg0: i32, %arg1: i32, %arg2: i32) -> (i32, i32) {
    %c0_i32 = arith.constant 0 : i32
    return %arg0, %arg1 : i32, i32
  }
}

</mosaic_0001>

<bundles_post_ra>
// kernel: tpu_custom_call.1
= control target key start
LH: loop header
LB: loop body
LE: loop exit
PB: predicated region body
PF: predicated region fallthrough
CT: control target
= control target key end

     0   :  { %8 = vsyncpa [#allocation4], 0  ;;  %s347_s0 = inlined_call_operand.hbm [shape: bf16[8,128], index: 0, kind: input, shape index: {}]   ;;  %s348_s1 = inlined_call_operand.hbm [shape: bf16[128,128], index: 1, kind: input, shape index: {}]   ;;  %s349_s2 = inlined_call_operand.vmem [shape: f32[1,128], index: 2, kind: input, shape index: {}]   ;;  %s350_s3 = inlined_call_operand.hbm [shape: f32[8,128], index: 3, kind: output, shape index: {}]  }
   0x1   :  { %9 = vsyncpa [#allocation7], 0 }
   0x2   :  { %10 = vsyncpa [#allocation5], 0  ;;  %s308_s12 = smov [#allocation3]   ;;  %s309_s14 = smov [#allocation6]  }
   0x3   :  { %s17_s13 = sshll.u32 %s308_s12, 4  ;;  %s26_s15 = sshll.u32 %s309_s14, 4  ;;  %s18_s13 = int_to_ptr.vmem [resolvable:$true] %s17_s13  ;;  %s27_s15 = int_to_ptr.vmem [resolvable:$true] %s26_s15 }
   0x4   :  { %s250_s16 = scalar_lea.vmem %s18_s13, 64  ;;  %p255_p1 = scmp.lt.s32.totalorder %s18_s13, %s18_s13 }
   0x5   :  { %p251_p0 = scmp.ne.s32.totalorder %s18_s13, %s250_s16  ;;  %p256_p2 = scmp.lt.s32.totalorder %s250_s16, %s250_s16 }
   0x7   :  { %p257_p3 = por %p256_p2, %p255_p1 }
   0x9   :  { %p258_p4 = pnand %p257_p3, %p251_p0 }
   0xb   :  { %261 = shalt.err (!%p258_p4)
}
   0xc   :  { %20 = dma.hbm_to_vmem [thread:$0]  %s347_s0, 64, %s18_s13, [#allocation4]  }
   0xd   :  { %s270_s19 = scalar_lea.vmem %s27_s15, 1024  ;;  %p275_p6 = scmp.lt.s32.totalorder %s27_s15, %s27_s15 }
   0xe   :  { %p271_p5 = scmp.ne.s32.totalorder %s27_s15, %s270_s19  ;;  %p276_p7 = scmp.lt.s32.totalorder %s270_s19, %s270_s19 }
  0x10   :  { %p277_p8 = por %p276_p7, %p275_p6 }
  0x12   :  { %p278_p9 = pnand %p277_p8, %p271_p5 }
  0x14   :  { %281 = shalt.err (!%p278_p9)
}
  0x15   :  { %s310_s20 = smov 64   ;;  %s311_s21 = smov 4  }
  0x16   :  { %32 = dma.hbm_to_vmem [thread:$0]  %s348_s1, 1024, %s27_s15, [#allocation7], %s310_s20, %s310_s20, %s311_s21  }
  0x17   :  { %302 = dma.done.wait [#allocation4], 64  }
  0x18   :  { %303 = vsyncadd [#allocation4], 4294967232 }
  0x19   :  { %304 = dma.done.wait [#allocation7], 1024  }
  0x1a   :  { %305 = vsyncadd [#allocation7], 4294966272  ;;  %v312_v0 = vmov 0.0   ;;  %vm313_vm0 = vmmov 0   ;;  %v234_v1 = vld [vmem:[#allocation6 + $0x38] sm:$0xff]   ;;  %v235_v2 = vld [vmem:[#allocation6 + $0x30] sm:$0xff]  }
  0x1b   :  { %207 = vmatprep.subr.bf16.mxu0 %v312_v0  ;;  %223 = vmatprep.mubr.msk.bf16.mxu0 %vm313_vm0, %v312_v0  ;;  %v236_v3 = vld [vmem:[#allocation6 + $0x28] sm:$0xff]   ;;  %v237_v4 = vld [vmem:[#allocation6 + $0x20] sm:$0xff]   ;;  %v238_v5 = vld [vmem:[#allocation6 + $0x18] sm:$0xff]   ;;  %s314_s24 = smov [#allocation8]  }
  0x1c   :  { %208 = vmatpush3.bf16.msra.mxu0 %v234_v1  ;;  %v239_v6 = vld [vmem:[#allocation6 + $0x10] sm:$0xff]   ;;  %v240_v7 = vld [vmem:[#allocation6 + $0x8] sm:$0xff]   ;;  %v241_v8 = vld [vmem:[#allocation6] sm:$0xff]   ;;  %s179_s25 = sshll.u32 %s314_s24, 4  ;;  %s180_s25 = int_to_ptr.vmem [resolvable:$true] %s179_s25 }
  0x1d   :  { %209 = vmatprep.subr.bf16.mxu0 %v312_v0  ;;  %v42_v9 = vld [vmem:[#allocation3] sm:$0xf]  ;;  %s282_s26 = scalar_lea.vmem %s180_s25, 128  ;;  %p287_p11 = scmp.lt.s32.totalorder %s180_s25, %s180_s25 }
  0x1e   :  { %v197_v10 = vld [vmem:[%s349_s2] ss:$0 sm:$0xff]  ;;  %p283_p10 = scmp.ne.s32.totalorder %s180_s25, %s282_s26  ;;  %p288_p12 = scmp.lt.s32.totalorder %s282_s26, %s282_s26 }
  0x20   :  { %210 = vmatpush3.bf16.msra.mxu0 %v235_v2  ;;  %p289_p13 = por %p288_p12, %p287_p11 }
  0x21   :  { %211 = vmatprep.subr.bf16.mxu0 %v312_v0 }
  0x22   :  { %p290_p0 = pnand %p289_p13, %p283_p10 }
  0x24   :  { %212 = vmatpush3.bf16.msra.mxu0 %v236_v3 }
  0x25   :  { %213 = vmatprep.subr.bf16.mxu0 %v312_v0 }
  0x28   :  { %214 = vmatpush3.bf16.msra.mxu0 %v237_v4 }
  0x29   :  { %215 = vmatprep.subr.bf16.mxu0 %v312_v0 }
  0x2c   :  { %216 = vmatpush3.bf16.msra.mxu0 %v238_v5 }
  0x2d   :  { %217 = vmatprep.subr.bf16.mxu0 %v312_v0 }
  0x30   :  { %218 = vmatpush3.bf16.msra.mxu0 %v239_v6 }
  0x31   :  { %219 = vmatprep.subr.bf16.mxu0 %v312_v0 }
  0x34   :  { %220 = vmatpush3.bf16.msra.mxu0 %v240_v7 }
  0x35   :  { %221 = vmatprep.subr.bf16.mxu0 %v312_v0 }
  0x38   :  { %222 = vmatpush3.bf16.msra.mxu0 %v241_v8 }
  0x3b   :  { %224 = vmatmul.mubr.bf16.vlgmr.msra.gmra.mxu0 %v42_v9 }
  0xfb   :  { %v141_v11 = vpop.f32.mrf.mxu0 }
  0xfc   :  { %v170_v12 = vadd.f32 %v197_v10, %v141_v11 }
  0xfd   :  { %v225_v13 = vpop.f32.mrf.mxu0 }
  0xfe   :  { %v171_v14 = vmax.f32 %v170_v12, 0.0 }
  0xff   :  { %v144_v15 = vpop.f32.mrf.mxu0 }
 0x100   :  { %172 = vst [vmem:[#allocation8] sm:$0xff] %v171_v14 }
 0x101   :  { %v226_v16 = vpop.f32.mrf.mxu0 }
 0x102   :  { %293 = shalt.err (!%p290_p0)
}
 0x103   :  { %182 = dma.vmem_to_hbm [thread:$0]  %s180_s25, 128, %s350_s3, [#allocation5]  }
 0x104   :  { %306 = dma.done.wait [#allocation5], 128  }
 0x105   :  { %307 = vsyncadd [#allocation5], 4294967168 }
 0x106   :  { %186 = vsyncpa [#allocation4], 1 }
 0x107   :  { %187 = vsyncpa [#allocation7], 1 }
 0x108   :  { %188 = vsyncpa [#allocation5], 1 }

</bundles_post_ra>
